<compile_context>
chip_gen: v7x
topology: tpu7x:2x2x1
jax: 0.10.0
libtpu: 0.0.40
codegen_flags: <defaults>
</compile_context>

<pallas_src>
import jax
import jax.numpy as jnp
from jax.experimental import pallas as pl
from jax.experimental.pallas import tpu as pltpu

INPUT_DIM = 4

DEFAULT_TILE_M = 65536   # lanes per grid step (multiple of 128)
CHUNK_LANES = 1024       # lanes per register-resident inner chunk
MIN_GRID_STEPS = 8       # keep the grid deep enough to pipeline / shard (v7x)
LANE = 128


def _time2vec_kernel(mall_ref, bias_ref, x_ref, o_ref):
    # mall_ref : (2D, D)  rows 0:D = diag(w0), rows D:2D = w^T   (resident)
    # bias_ref : (2D, 1)  rows 0:D = b0,       rows D:2D = b     (resident)
    # x_ref    : (D,  T)  features on sublanes, examples on lanes
    # o_ref    : (2D, T)  rows 0:D = v0, rows D:2D = v1
    d = x_ref.shape[0]
    two_d = o_ref.shape[0]
    tile = x_ref.shape[1]

    # Hoisted per-grid-step values (a couple of vregs).
    mall = mall_ref[...]
    bias = bias_ref[...]
    mcols = [mall[:, k:k + 1] for k in range(d)]                 # D x (2D, 1)
    row = jax.lax.broadcasted_iota(jnp.int32, (two_d, 1), 0)
    is_lin = row < d                                             # (2D, 1) mask

    def affine(col, width):
        # Mall @ x[:, col:col+width] + bias via D broadcast-FMAs on the VPU
        # (D=4 is far too small for the MXU).  Result (2D, width), in vregs.
        acc = mcols[0] * x_ref[pl.ds(0, 1), pl.ds(col, width)] + bias
        for k in range(1, d):
            acc = acc + mcols[k] * x_ref[pl.ds(k, 1), pl.ds(col, width)]
        return acc

    def emit_single(col, width):
        a = affine(col, width)
        o_ref[:, pl.ds(col, width)] = jnp.where(
            is_lin, a, jnp.sin(a)).astype(o_ref.dtype)

    def emit_pair(col, width):
        # Pack the sin rows (D:2D) of two adjacent chunks into one full vreg
        # set (sublane roll by D + select), run sin once, unpack.  Halves the
        # dominant VALU cost; rolls go to the XLU slot which has slack here.
        a0 = affine(col, width)
        a1 = affine(col + width, width)
        packed = jnp.where(is_lin, pltpu.roll(a0, shift=d, axis=0), a1)
        sp = jnp.sin(packed)
        out0 = jnp.where(is_lin, a0, pltpu.roll(sp, shift=d, axis=0))
        out1 = jnp.where(is_lin, a1, sp)
        o_ref[:, pl.ds(col, width)] = out0.astype(o_ref.dtype)
        o_ref[:, pl.ds(col + width, width)] = out1.astype(o_ref.dtype)

    # Strip-mine the tile; all chunk sizes are static (trace time).
    ch = min(CHUNK_LANES, tile)
    n_full = tile // ch
    n_pairs = n_full // 2
    rem = tile - n_full * ch

    if n_pairs > 0:
        def pair_body(j, carry):
            col = pl.multiple_of(j * (2 * ch), 2 * ch)
            emit_pair(col, ch)
            return carry

        if n_pairs <= 8:
            unroll = True
        elif n_pairs % 8 == 0:
            unroll = 8
        elif n_pairs % 4 == 0:
            unroll = 4
        else:
            unroll = True
        jax.lax.fori_loop(0, n_pairs, pair_body, 0, unroll=unroll)

    if n_full % 2 == 1:                      # leftover unpaired full chunk
        emit_single(2 * n_pairs * ch, ch)
    if rem > 0:                              # ragged tail of the tile
        emit_single(n_full * ch, rem)


def _pick_tile(m, tile_m):
    """Largest lane-aligned tile <= tile_m that keeps >= MIN_GRID_STEPS steps."""
    target = pl.cdiv(pl.cdiv(m, MIN_GRID_STEPS), LANE) * LANE
    tile = min(tile_m, max(target, LANE))
    if tile >= m:
        return m          # single block covering the full (possibly ragged) M
    return tile           # multiple of 128; partial last block is masked


def time2vec(x, w0, w, b, b0, *, tile_m=DEFAULT_TILE_M, out_dtype=None):
    """x: (..., D).  Returns (..., 2D) = cat([w0*x + b0, sin(x@w + b)], -1)."""
    orig_shape = x.shape
    d = orig_shape[-1]
    out_dtype = x.dtype if out_dtype is None else out_dtype

    # Flatten leading dims and present x lane-major (D, M).  This transpose
    # (and the inverse on the output) is the only wrapper-side HBM traffic.
    x2 = x.reshape(-1, d)
    m = x2.shape[0]
    xt = x2.T

    # Pack the tiny parameters once:  Mall = [diag(w0); w^T],  bias = [b0; b].
    mall = jnp.concatenate([jnp.diag(w0.reshape(d)), w.T], axis=0).astype(x.dtype)
    bias = jnp.concatenate(
        [jnp.broadcast_to(b0.reshape(1, 1), (d, 1)), b.reshape(d, 1)], axis=0
    ).astype(x.dtype)

    tile = _pick_tile(m, tile_m)
    grid = (pl.cdiv(m, tile),)     # partial last block: no pad copy needed

    x_bytes = m * d * jnp.dtype(x.dtype).itemsize
    o_bytes = m * 2 * d * jnp.dtype(out_dtype).itemsize

    out_t = pl.pallas_call(
        _time2vec_kernel,
        out_shape=jax.ShapeDtypeStruct((2 * d, m), out_dtype),
        grid=grid,
        in_specs=[
            pl.BlockSpec((2 * d, d), lambda i: (0, 0)),   # Mall  (resident)
            pl.BlockSpec((2 * d, 1), lambda i: (0, 0)),   # bias  (resident)
            pl.BlockSpec((d, tile), lambda i: (0, i)),    # x tile (lane-dense)
        ],
        out_specs=pl.BlockSpec((2 * d, tile), lambda i: (0, i)),
        compiler_params=pltpu.CompilerParams(
            dimension_semantics=("parallel",),
        ),
        cost_estimate=pl.CostEstimate(
            flops=4 * d * d * m + 2 * d * m,   # unrolled FMAs + bias add
            transcendentals=2 * d * m,         # upper bound (packing ~halves it)
            bytes_accessed=x_bytes + o_bytes,
        ),
    )(mall, bias, xt)

    return out_t.T.reshape(*orig_shape[:-1], 2 * d)


if __name__ == "__main__":
    key = jax.random.PRNGKey(0)
    k_x, k_w0, k_w, k_b, k_b0 = jax.random.split(key, 5)

    d = INPUT_DIM
    # Deterministic parameter init (shapes match nn.Parameter(torch.randn(...))).
    w0 = jax.random.normal(k_w0, (1, d), dtype=jnp.float32)
    w = jax.random.normal(k_w, (d, d), dtype=jnp.float32)
    b = jax.random.normal(k_b, (1, d), dtype=jnp.float32)
    b0 = jax.random.normal(k_b0, (1,), dtype=jnp.float32)

    def reference(x):
        v1 = jnp.sin(jnp.matmul(x, w, precision=jax.lax.Precision.HIGHEST) + b)
        v0 = w0 * x + b0
        return jnp.concatenate([v0, v1], axis=-1)

    # Small shape from the module (batch=2, seq=8, input_dim=4) plus two shapes
    # that exercise the partial-last-block path and the paired-sin path.
    shapes = [(2, 8, d), (3, 677, d), (4, 4096, d)]
    for i, shp in enumerate(shapes):
        kx = jax.random.fold_in(k_x, i)
        x = jax.random.normal(kx, shp, dtype=jnp.float32)
        out = jax.block_until_ready(time2vec(x, w0, w, b, b0))
        ref = reference(x)
        assert out.shape == (*shp[:-1], 2 * d), (out.shape, shp)
        assert jnp.allclose(out, ref, atol=1e-4, rtol=1e-4), f"mismatch for {shp}"

    print("KERNEL_OK")
</pallas_src>

<mosaic_0001>
module attributes {stable_mosaic.version = 11 : i64} {
  func.func @_time2vec_kernel(%arg0: i32, %arg1: memref<8x4xf32, #tpu.memory_space<vmem>>, %arg2: memref<8x1xf32, #tpu.memory_space<vmem>>, %arg3: memref<4x16xf32, #tpu.memory_space<vmem>>, %arg4: memref<8x16xf32, #tpu.memory_space<vmem>>) attributes {dimension_semantics = [#tpu.dimension_semantics<parallel>], iteration_bounds = array<i64: 1>, scalar_prefetch = 0 : i64, scratch_operands = 0 : i64, tpu.core_type = #tpu.core_type<tc>, window_params = [{pipeline_mode = #tpu.pipeline_mode<synchronous>, transform_indices = @transform_0, window_bounds = array<i64: 8, 4>}, {pipeline_mode = #tpu.pipeline_mode<synchronous>, transform_indices = @transform_1, window_bounds = array<i64: 8, 1>}, {transform_indices = @transform_2, window_bounds = array<i64: 4, 16>}, {transform_indices = @transform_3, window_bounds = array<i64: 8, 16>}]} {
    %c0 = arith.constant 0 : index
    %c0_0 = arith.constant 0 : index
    %0 = vector.load %arg1[%c0, %c0_0] : memref<8x4xf32, #tpu.memory_space<vmem>>, vector<8x4xf32>
    %c0_1 = arith.constant 0 : index
    %c0_2 = arith.constant 0 : index
    %1 = vector.load %arg2[%c0_1, %c0_2] : memref<8x1xf32, #tpu.memory_space<vmem>>, vector<8x1xf32>
    %2 = vector.extract_strided_slice %0 {offsets = [0, 0], sizes = [8, 1], strides = [1, 1]} : vector<8x4xf32> to vector<8x1xf32>
    %3 = vector.extract_strided_slice %0 {offsets = [0, 1], sizes = [8, 1], strides = [1, 1]} : vector<8x4xf32> to vector<8x1xf32>
    %4 = vector.extract_strided_slice %0 {offsets = [0, 2], sizes = [8, 1], strides = [1, 1]} : vector<8x4xf32> to vector<8x1xf32>
    %5 = vector.extract_strided_slice %0 {offsets = [0, 3], sizes = [8, 1], strides = [1, 1]} : vector<8x4xf32> to vector<8x1xf32>
    %6 = tpu.iota {dimensions = array<i32: 0>} : vector<8x1xi32>
    %c4_i32 = arith.constant 4 : i32
    %7 = vector.broadcast %c4_i32 : i32 to vector<8x1xi32>
    %8 = arith.cmpi slt, %6, %7 : vector<8x1xi32>
    %c0_3 = arith.constant 0 : index
    %c0_4 = arith.constant 0 : index
    %9 = vector.load %arg3[%c0_3, %c0_4] : memref<4x16xf32, #tpu.memory_space<vmem>>, vector<1x16xf32>
    %10 = vector.broadcast %2 : vector<8x1xf32> to vector<8x16xf32>
    %11 = vector.broadcast %9 : vector<1x16xf32> to vector<8x16xf32>
    %12 = arith.mulf %10, %11 : vector<8x16xf32>
    %13 = vector.broadcast %1 : vector<8x1xf32> to vector<8x16xf32>
    %14 = arith.addf %12, %13 : vector<8x16xf32>
    %c1 = arith.constant 1 : index
    %c0_5 = arith.constant 0 : index
    %15 = vector.load %arg3[%c1, %c0_5] : memref<4x16xf32, #tpu.memory_space<vmem>>, vector<1x16xf32>
    %16 = vector.broadcast %3 : vector<8x1xf32> to vector<8x16xf32>
    %17 = vector.broadcast %15 : vector<1x16xf32> to vector<8x16xf32>
    %18 = arith.mulf %16, %17 : vector<8x16xf32>
    %19 = arith.addf %14, %18 : vector<8x16xf32>
    %c2 = arith.constant 2 : index
    %c0_6 = arith.constant 0 : index
    %20 = vector.load %arg3[%c2, %c0_6] : memref<4x16xf32, #tpu.memory_space<vmem>>, vector<1x16xf32>
    %21 = vector.broadcast %4 : vector<8x1xf32> to vector<8x16xf32>
    %22 = vector.broadcast %20 : vector<1x16xf32> to vector<8x16xf32>
    %23 = arith.mulf %21, %22 : vector<8x16xf32>
    %24 = arith.addf %19, %23 : vector<8x16xf32>
    %c3 = arith.constant 3 : index
    %c0_7 = arith.constant 0 : index
    %25 = vector.load %arg3[%c3, %c0_7] : memref<4x16xf32, #tpu.memory_space<vmem>>, vector<1x16xf32>
    %26 = vector.broadcast %5 : vector<8x1xf32> to vector<8x16xf32>
    %27 = vector.broadcast %25 : vector<1x16xf32> to vector<8x16xf32>
    %28 = arith.mulf %26, %27 : vector<8x16xf32>
    %29 = arith.addf %24, %28 : vector<8x16xf32>
    %30 = math.sin %29 : vector<8x16xf32>
    %31 = vector.shape_cast %8 : vector<8x1xi1> to vector<8x1xi1>
    %32 = vector.broadcast %31 : vector<8x1xi1> to vector<8x16xi1>
    %33 = arith.select %32, %29, %30 : vector<8x16xi1>, vector<8x16xf32>
    %c0_8 = arith.constant 0 : index
    %c0_9 = arith.constant 0 : index
    %34 = vector.load %arg4[%c0_8, %c0_9] : memref<8x16xf32, #tpu.memory_space<vmem>>, vector<8x16xf32>
    tpu.vector_store %arg4[%c0_8, %c0_9], %33 {strides = array<i32>} : memref<8x16xf32, #tpu.memory_space<vmem>>, vector<8x16xf32>,
    return
  }
  func.func @transform_0(%arg0: i32) -> (i32, i32) {
    %c0_i32 = arith.constant 0 : i32
    %c0_i32_0 = arith.constant 0 : i32
    %c0_i32_1 = arith.constant 0 : i32
    return %c0_i32, %c0_i32_0 : i32, i32
  }
  func.func @transform_1(%arg0: i32) -> (i32, i32) {
    %c0_i32 = arith.constant 0 : i32
    %c0_i32_0 = arith.constant 0 : i32
    %c0_i32_1 = arith.constant 0 : i32
    return %c0_i32, %c0_i32_0 : i32, i32
  }
  func.func @transform_2(%arg0: i32) -> (i32, i32) {
    %c0_i32 = arith.constant 0 : i32
    %c0_i32_0 = arith.constant 0 : i32
    return %c0_i32, %arg0 : i32, i32
  }
  func.func @transform_3(%arg0: i32) -> (i32, i32) {
    %c0_i32 = arith.constant 0 : i32
    %c0_i32_0 = arith.constant 0 : i32
    return %c0_i32, %arg0 : i32, i32
  }
}

</mosaic_0001>

<bundles_post_ra>
// kernel: tpu_custom_call.1
= control target key start
LH: loop header
LB: loop body
LE: loop exit
PB: predicated region body
PF: predicated region fallthrough
CT: control target
= control target key end

     0   :  { %v248_v1 = vmov 0   ;;  %v249_v2 = vmov 1   ;;  %s331_s0 = inlined_call_operand.vmem [shape: f32[8,4], index: 0, kind: input, shape index: {}]   ;;  %s332_s1 = inlined_call_operand.vmem [shape: f32[8,1], index: 1, kind: input, shape index: {}]   ;;  %s333_s2 = inlined_call_operand.vmem [shape: f32[4,16], index: 2, kind: input, shape index: {}]   ;;  %s334_s3 = inlined_call_operand.hbm [shape: f32[8,16], index: 3, kind: output, shape index: {}]  }
   0x1   :  { %v15_v0 = vld [vmem:[%s331_s0] sm:$0xff]  ;;  %216 = vset.pattern.permute.xlu0 %v248_v1  ;;  %217 = vset.pattern.permute.xlu1 %v249_v2 }
   0x2   :  { %8 = vsyncpa [#allocation3], 0  ;;  %23 = vperm.xlu0 %216, %v15_v0   ;;  %39 = vperm.xlu1 %217, %v15_v0   ;;  %v16_v3 = vld [vmem:[%s332_s1] sm:$0xff]  ;;  %v250_v4 = vmov 2   ;;  %v251_v5 = vmov 3   ;;  %vm177_vm14 = vcmask 130048  }
   0x3   :  { %v193_v6 = vld [vmem:[%s333_s2] ss:$0 sm:$0xff]  ;;  %v194_v9 = vld [vmem:[%s333_s2 + $0x1] ss:$0 sm:$0xff]  ;;  %v195_v11 = vld [vmem:[%s333_s2 + $0x2] ss:$0 sm:$0xff] }
   0x4   :  { %v196_v18 = vld [vmem:[%s333_s2 + $0x3] ss:$0 sm:$0xff]  ;;  %v252_v33 = vmov 683565275   ;;  %v253_v35 = vmov 2475754826  }
   0x5   :  { %v254_v38 = vmov 2131351028   ;;  %v255_v41 = vmov 2102212464   ;;  %v256_v44 = vmov 920167782  }
   0x6   :  { %33 = vperm.xlu0 %216, %v16_v3   ;;  %218 = vset.pattern.permute.xlu1 %v250_v4  ;;  %v257_v47 = vmov 1326507024   ;;  %s258_s2 = smov [#allocation2]  }
   0x7   :  { %50 = vperm.xlu1 %218, %v15_v0   ;;  %s185_s22 = sshll.u32 %s258_s2, 4  ;;  %s186_s22 = int_to_ptr.vmem [resolvable:$true] %s185_s22 }
   0x8   :  { %s224_s23 = scalar_lea.vmem %s186_s22, 128  ;;  %p229_p1 = scmp.lt.s32.totalorder %s186_s22, %s186_s22 }
   0x9   :  { %p225_p0 = scmp.ne.s32.totalorder %s186_s22, %s224_s23  ;;  %p230_p2 = scmp.lt.s32.totalorder %s224_s23, %s224_s23 }
   0xa   :  { %219 = vset.pattern.permute.xlu0 %v251_v5 }
   0xb   :  { %61 = vperm.xlu0 %219, %v15_v0   ;;  %p231_p3 = por %p230_p2, %p229_p1 }
   0xd   :  { %p232_p4 = pnand %p231_p3, %p225_p0 }
  0x81   :  { %v24_v7 = vpop.permute.xlu0 %23  ;;  %v40_v8 = vpop.permute.xlu1 %39 }
  0x82   :  { %v30_v10 = vmul.f32 %v193_v6, %v24_v7  ;;  %v46_v13 = vmul.f32 %v194_v9, %v40_v8 }
  0x85   :  { %v34_v12 = vpop.permute.xlu0 %33 }
  0x86   :  { %v36_v14 = vadd.f32 %v34_v12, %v30_v10  ;;  %v51_v15 = vpop.permute.xlu1 %50 }
  0x87   :  { %v57_v16 = vmul.f32 %v195_v11, %v51_v15 }
  0x88   :  { %v47_v17 = vadd.f32 %v46_v13, %v36_v14 }
  0x8a   :  { %v58_v19 = vadd.f32 %v57_v16, %v47_v17  ;;  %v62_v20 = vpop.permute.xlu0 %61 }
  0x8b   :  { %v68_v21 = vmul.f32 %v196_v18, %v62_v20 }
  0x8d   :  { %v297_v22 = vadd.f32 %v68_v21, %v58_v19 }
  0x8f   :  { %v73_v23 = vand.u32 2139095040, %v297_v22  ;;  %v70_v27 = vand.u32 2147483647, %v297_v22  ;;  %vm72_vm7 = vcmp.lt.s32.totalorder %v297_v22, 0  ;;  %vm162_vm13 = vweird.f32 %v297_v22 }
  0x91   :  { %v74_v24 = vshrl.u32 %v73_v23, 23  ;;  %v77_v31 = vand.u32 8388607, %v70_v27  ;;  %vm71_vm8 = vcmp.le.f32.partialorder %v70_v27, 0.7853982 }
  0x93   :  { %v197_v25 = vadd.s32 4294967169, %v74_v24  ;;  %v78_v49 = vor.u32 8388608, %v77_v31 }
  0x95   :  { %v80_v26 = vadd.s32 1, %v197_v25  ;;  %v118_v63 = vshll.u32 %v78_v49, 8 }
  0x97   :  { %vm81_vm0 = vcmp.gt.s32.totalorder %v80_v26, 0 }
  0x98   :  { %v82_v28 = vsel %vm81_vm0, %v80_v26, 0 }
  0x99   :  { %v84_v29 = vand.u32 31, %v82_v28  ;;  %v83_v32 = vshrl.u32 %v82_v28, 5 }
  0x9b   :  { %v85_v30 = vsub.s32 32, %v84_v29  ;;  %v87_v34 = vshll.u32 %v252_v33, %v84_v29  ;;  %v90_v36 = vshll.u32 %v253_v35, %v84_v29  ;;  %v93_v40 = vshll.u32 %v254_v38, %v84_v29 }
  0x9c   :  { %v96_v43 = vshll.u32 %v255_v41, %v84_v29  ;;  %v99_v46 = vshll.u32 %v256_v44, %v84_v29  ;;  %vm102_vm1 = vcmp.lt.s32.totalorder %v83_v32, 1  ;;  %vm105_vm2 = vcmp.lt.s32.totalorder %v83_v32, 4 }
  0x9d   :  { %v88_v37 = vshrl.u32 %v253_v35, %v85_v30  ;;  %v91_v39 = vshrl.u32 %v254_v38, %v85_v30  ;;  %v94_v42 = vshrl.u32 %v255_v41, %v85_v30  ;;  %v97_v45 = vshrl.u32 %v256_v44, %v85_v30 }
  0x9e   :  { %v100_v48 = vshrl.u32 %v257_v47, %v85_v30  ;;  %v86_v58 = vshrl.u32 %v252_v33, %v85_v30  ;;  %vm104_vm3 = vcmp.lt.s32.totalorder %v83_v32, 3  ;;  %vm103_vm4 = vcmp.lt.s32.totalorder %v83_v32, 2 }
  0x9f   :  { %v89_v50 = vor.u32 %v88_v37, %v87_v34  ;;  %v92_v51 = vor.u32 %v91_v39, %v90_v36  ;;  %v95_v52 = vor.u32 %v94_v42, %v93_v40  ;;  %v98_v53 = vor.u32 %v97_v45, %v96_v43 }
  0xa0   :  { %v101_v54 = vor.u32 %v100_v48, %v99_v46  ;;  %v17_v43 = vlaneseq }
  0xa1   :  { %v107_v55 = vsel %vm105_vm2, %v95_v52, 2102212464  ;;  %v110_v56 = vsel %vm102_vm1, %v89_v50, %v92_v51  ;;  %v114_v57 = vsel %vm102_vm1, %v92_v51, %v95_v52  ;;  %v111_v59 = vsel %vm105_vm2, %v98_v53, 920167782 }
  0xa2   :  { %v115_v60 = vsel %vm105_vm2, %v101_v54, 1326507024  ;;  %v112_v61 = vsel %vm104_vm3, %v95_v52, %v111_v59  ;;  %v106_v0 = vsel %vm102_vm1, %v86_v58, %v89_v50  ;;  %v108_v1 = vsel %vm104_vm3, %v92_v51, %v107_v55 }
  0xa3   :  { %v116_v62 = vsel %vm104_vm3, %v98_v53, %v115_v60  ;;  %v113_v2 = vsel %vm103_vm4, %v110_v56, %v112_v61  ;;  %v109_v8 = vsel %vm103_vm4, %v106_v0, %v108_v1  ;;  %v18_v46 = vshrl.u32 %v17_v43, 7 }
  0xa4   :  { %v117_v3 = vsel %vm103_vm4, %v114_v57, %v116_v62  ;;  %v306_v6 = vmul.u32.u64.low %v118_v63, %v113_v2  ;;  %v307_v7 = vmul.u32.u64.high %v118_v63, %v113_v2, %v306_v6  ;;  %v125_v10 = vmul.u32 %v118_v63, %v109_v8 }
  0xa5   :  { %v303_v4 = vmul.u32.u64.low %v118_v63, %v117_v3  ;;  %v304_v5 = vmul.u32.u64.high %v118_v63, %v117_v3, %v303_v4  ;;  %vm19_vm11 = vcmp.lt.s32.totalorder %v18_v46, 4 }
  0xa6   :  { %v128_v9 = vadd.s32 1, %v307_v7 }
  0xa7   :  { %vm127_vm5 = vc.u32 %v304_v5, %v306_v6  ;;  %v126_v23 = vadd.s32 %v306_v6, %v304_v5 }
  0xa8   :  { %v129_v11 = vsel %vm127_vm5, %v128_v9, %v307_v7 }
  0xa9   :  { %v130_v12 = vadd.s32 %v129_v11, %v125_v10 }
  0xab   :  { %v131_v13 = vadd.s32 536870912, %v130_v12 }
  0xad   :  { %v132_v14 = vshrl.u32 %v131_v13, 30 }
  0xaf   :  { %v133_v15 = vshll.u32 %v132_v14, 30  ;;  %v156_v36 = vsub.s32 4, %v132_v14 }
  0xb1   :  { %v134_v16 = vsub.s32 %v130_v12, %v133_v15  ;;  %v157_v39 = vsel %vm72_vm7, %v156_v36, %v132_v14 }
  0xb2   :  { %v159_v41 = vsel %vm71_vm8, 0, %v157_v39 }
  0xb3   :  { %v136_v17 = vsub.s32 0, %v134_v16  ;;  %v163_v42 = vadd.s32 3, %v159_v41 }
  0xb5   :  { %v198_v18 = vmin.u32 %v136_v17, %v134_v16  ;;  %v164_v44 = vand.u32 3, %v163_v42 }
  0xb7   :  { %v138_v19 = vclz %v198_v18  ;;  %vm169_vm9 = vcmp.eq.s32.totalorder %v164_v44, 2  ;;  %vm166_vm10 = vcmp.eq.s32.totalorder %v164_v44, 0  ;;  %vm165_vm12 = vcmp.lt.s32.totalorder %v164_v44, 2 }
  0xb9   :  { %v199_v20 = vadd.s32 4294967294, %v138_v19 }
  0xbb   :  { %vm200_vm6 = vcmp.lt.s32.totalorder %v199_v20, 0 }
  0xbc   :  { %v141_v21 = vsel %vm200_vm6, 0, %v199_v20 }
  0xbd   :  { %v142_v24 = vsub.s32 32, %v141_v21  ;;  %v146_v25 = vsub.s32 4294967266, %v141_v21  ;;  %v143_v26 = vshll.u32 %v134_v16, %v141_v21 }
  0xbf   :  { %v144_v28 = vshrl.u32 %v126_v23, %v142_v24  ;;  %v147_v29 = vadd.s32 127, %v146_v25 }
  0xc1   :  { %v145_v30 = vor.u32 %v144_v28, %v143_v26  ;;  %v148_v31 = vshll.u32 %v147_v29, 23 }
  0xc3   :  { %v149_v32 = vor.u32 4788187, %v148_v31  ;;  %v152_v34 = vcvt.s32.f32 %v145_v30 }
  0xc5   :  { %v150_v33 = vand.u32 2147483647, %v149_v32 }
  0xc7   :  { %v153_v35 = vmul.f32 %v152_v34, %v150_v33 }
  0xc9   :  { %v154_v37 = vxor.u32 2147483648, %v153_v35 }
  0xcb   :  { %v155_v38 = vsel %vm72_vm7, %v154_v37, %v153_v35 }
  0xcc   :  { %v158_v40 = vsel %vm71_vm8, %v297_v22, %v155_v38 }
  0xcd   :  { %220 = vcosq.f32 %v158_v40 }
  0xce   :  { %222 = vsinq.f32 %v158_v40 }
  0xd7   :  { %v221_v45 = vpop.eup %220 }
  0xd8   :  { %v223_v47 = vpop.eup %222  ;;  %v170_v48 = vxor.u32 2147483648, %v221_v45 }
  0xd9   :  { %v167_v49 = vxor.u32 2147483648, %v223_v47 }
  0xda   :  { %v171_v50 = vsel %vm169_vm9, %v170_v48, %v223_v47 }
  0xdb   :  { %v168_v27 = vsel %vm166_vm10, %v221_v45, %v167_v49 }
  0xdc   :  { %v172_v51 = vsel %vm165_vm12, %v168_v27, %v171_v50 }
  0xdd   :  { %v173_v52 = vsel %vm162_vm13, nan, %v172_v51 }
  0xde   :  { %v176_v53 = vsel %vm19_vm11, %v297_v22, %v173_v52 }
  0xdf   :  { %178 = vst.msk [vmem:[#allocation2] sm:$0xff] %vm177_vm14, %v176_v53 }
  0xe0   :  { %235 = shalt.err (!%p232_p4)
}
  0xe1   :  { %s236_s26 = scalar_lea.hbm %s334_s3, 128 }
  0xe2   :  { %p237_p5 = scmp.ne.s32.totalorder %s334_s3, %s236_s26  ;;  %p240_p6 = scmp.lt.u32.totalorder %s236_s26, %s334_s3 }
  0xe4   :  { %p242_p7 = pnand %p240_p6, %p237_p5 }
  0xe6   :  { %245 = shalt.err (!%p242_p7)
}
  0xe7   :  { %188 = dma.vmem_to_hbm [thread:$0]  %s186_s22, 128, %s334_s3, [#allocation3]  }
  0xe8   :  { %246 = dma.done.wait [#allocation3], 128  }
  0xe9   :  { %247 = vsyncadd [#allocation3], 4294967168 }
  0xea   :  { %192 = vsyncpa [#allocation3], 1 }

</bundles_post_ra>
